<compile_context>
chip_gen: v6e
topology: v6e:2x2x1
jax: 0.10.0
libtpu: 0.0.40
codegen_flags: <defaults>
</compile_context>

<pallas_src>
import math

import jax
import jax.numpy as jnp
from jax.experimental import pallas as pl
from jax.experimental.pallas import tpu as pltpu

_GELU_C = math.sqrt(2.0 / math.pi)


def _ffn_kernel(x_ref, wfc_ref, bfc_ref, wproj_ref, bproj_ref, o_ref, acc_ref):
    # x_ref:     (tm, C)   input row tile (resident across the H axis)
    # wfc_ref:   (C, th)   fc weight chunk
    # bfc_ref:   (1, th)   fc bias chunk
    # wproj_ref: (th, C)   proj weight chunk
    # bproj_ref: (1, C)    proj bias (full)
    # o_ref:     (tm, C)   output tile (written once, at the last H chunk)
    # acc_ref:   (tm, C)   f32 accumulator scratch
    h_idx = pl.program_id(1)

    @pl.when(h_idx == 0)
    def _init():
        acc_ref[...] = jnp.zeros_like(acc_ref)

    # c_fc chunk: native-dtype operands on the MXU, f32 accumulation.
    h = jnp.dot(x_ref[...], wfc_ref[...], preferred_element_type=jnp.float32)
    h = h + bfc_ref[...].astype(jnp.float32)

    # new_gelu (tanh approximation, exactly as in the PyTorch reference), f32.
    h = 0.5 * h * (1.0 + jnp.tanh(_GELU_C * (h + 0.044715 * (h * h * h))))

    # c_proj chunk: cast down to weight dtype for the MXU, accumulate in f32.
    acc_ref[...] += jnp.dot(h.astype(wproj_ref.dtype), wproj_ref[...],
                            preferred_element_type=jnp.float32)

    @pl.when(h_idx == pl.num_programs(1) - 1)
    def _finalize():
        y = acc_ref[...] + bproj_ref[...].astype(jnp.float32)
        # dropout: identity (eval mode / p = 0)
        o_ref[...] = y.astype(o_ref.dtype)


def _round_up(x, m):
    return (x + m - 1) // m * m


def _vmem_capacity_bytes():
    # Chip-aware VMEM capacity (128 MiB on v5e/v6e, 64 MiB on v7x).  The
    # fallback is the conservative 64 MiB: it only shrinks tile sizes, it never
    # changes numerics or the execution path.
    try:
        return int(pltpu.get_tpu_info().vmem_capacity_bytes)
    except Exception:
        return 64 * 1024 * 1024


def _vmem_needed(tm, th, c, xbytes, wbytes):
    """Honest resident-VMEM estimate for one pipeline configuration."""
    return (
        2 * tm * c * xbytes              # x row tile, double-buffered
        + 2 * tm * c * xbytes            # output tile, double-buffered
        + 2 * (c * th + th) * wbytes     # w_fc + b_fc chunks, double-buffered
        + 2 * (th * c + c) * wbytes      # w_proj chunk + b_proj, double-buffered
        + tm * c * 4                     # f32 accumulator scratch
        + tm * th * (4 + wbytes)         # f32 GELU intermediate + cast-down copy
    )


def feedforward_pallas(x, w_fc, b_fc, w_proj, b_proj, *, tm=512):
    """x: [B, T, C]; w_fc: [C, H]; b_fc: [H]; w_proj: [H, C]; b_proj: [C]."""
    B, T, C = x.shape
    H = w_fc.shape[1]
    M = B * T

    xbytes = jnp.dtype(x.dtype).itemsize
    wbytes = jnp.dtype(w_fc.dtype).itemsize
    sublane = max(8, 32 // xbytes)           # 8 for f32, 16 for bf16, 32 for i8

    # Lane-dense embedding dim (keeps the output store unmasked).
    C_pad = _round_up(C, 128)

    # ---- tile selection under a chip-aware VMEM budget ----------------------
    cap = _vmem_capacity_bytes()
    budget = int(cap * 0.85)                 # headroom for compiler scratch

    tm_eff = max(sublane, min(_round_up(tm, sublane), _round_up(M, sublane)))
    h_full = _round_up(H, 128)
    th_cands = [h_full] + [c for c in (4096, 2048, 1024, 512, 256, 128)
                           if c < h_full]

    th_eff = 128
    while True:
        found = False
        for th in th_cands:
            if _vmem_needed(tm_eff, th, C_pad, xbytes, wbytes) <= budget:
                th_eff, found = th, True
                break
        if found or tm_eff <= sublane:
            break
        tm_eff = max(sublane, _round_up(tm_eff // 2, sublane))

    m_pad = _round_up(M, tm_eff)
    h_pad = _round_up(H, th_eff)

    # ---- pad operands (zero padding is an exact no-op for the result) -------
    x2d = jnp.pad(x.reshape(M, C), ((0, m_pad - M), (0, C_pad - C)))
    w_fc_p = jnp.pad(w_fc, ((0, C_pad - C), (0, h_pad - H)))
    b_fc_p = jnp.pad(b_fc.reshape(1, H), ((0, 0), (0, h_pad - H)))
    w_proj_p = jnp.pad(w_proj, ((0, h_pad - H), (0, C_pad - C)))
    b_proj_p = jnp.pad(b_proj.reshape(1, C), ((0, 0), (0, C_pad - C)))

    grid = (m_pad // tm_eff, h_pad // th_eff)

    needed = _vmem_needed(tm_eff, th_eff, C_pad, xbytes, wbytes)
    vmem_limit = int(min(cap, max(needed + (2 << 20), 16 << 20)))

    cost = pl.CostEstimate(
        flops=4 * m_pad * C_pad * h_pad,                   # two matmuls
        transcendentals=m_pad * h_pad,                     # tanh
        bytes_accessed=(2 * m_pad * C_pad * xbytes         # x read + y write
                        + grid[0] * 2 * C_pad * h_pad * wbytes  # weight streams
                        + (h_pad + C_pad) * wbytes),       # biases
    )

    out = pl.pallas_call(
        _ffn_kernel,
        out_shape=jax.ShapeDtypeStruct((m_pad, C_pad), x.dtype),
        grid_spec=pltpu.PrefetchScalarGridSpec(
            num_scalar_prefetch=0,
            grid=grid,
            in_specs=[
                pl.BlockSpec((tm_eff, C_pad), lambda i, h: (i, 0)),   # x rows
                pl.BlockSpec((C_pad, th_eff), lambda i, h: (0, h)),   # w_fc chunk
                pl.BlockSpec((1, th_eff), lambda i, h: (0, h)),       # b_fc chunk
                pl.BlockSpec((th_eff, C_pad), lambda i, h: (h, 0)),   # w_proj chunk
                pl.BlockSpec((1, C_pad), lambda i, h: (0, 0)),        # b_proj
            ],
            out_specs=pl.BlockSpec((tm_eff, C_pad), lambda i, h: (i, 0)),
            scratch_shapes=[pltpu.VMEM((tm_eff, C_pad), jnp.float32)],
        ),
        compiler_params=pltpu.CompilerParams(
            dimension_semantics=("parallel", "arbitrary"),
            vmem_limit_bytes=vmem_limit,
        ),
        cost_estimate=cost,
    )(x2d, w_fc_p, b_fc_p, w_proj_p, b_proj_p)

    return out[:M, :C].reshape(B, T, C)


def _reference(x, w_fc, b_fc, w_proj, b_proj):
    h = jnp.dot(x, w_fc) + b_fc
    h = 0.5 * h * (1.0 + jnp.tanh(_GELU_C * (h + 0.044715 * h**3)))
    return jnp.dot(h, w_proj) + b_proj


if __name__ == "__main__":
    # Small config: batch=2, seq=16, n_embd=128 (hidden = 4 * n_embd = 512)
    B, T, C = 2, 16, 128
    H = 4 * C

    key = jax.random.PRNGKey(0)
    kx, k1, k2, k3, k4 = jax.random.split(key, 5)

    x = jax.random.normal(kx, (B, T, C), dtype=jnp.float32)
    # Deterministic "Linear-like" init (scaled normal), stored pre-transposed.
    w_fc = jax.random.normal(k1, (C, H), dtype=jnp.float32) * (1.0 / math.sqrt(C))
    b_fc = jax.random.normal(k2, (H,), dtype=jnp.float32) * 0.02
    w_proj = jax.random.normal(k3, (H, C), dtype=jnp.float32) * (1.0 / math.sqrt(H))
    b_proj = jax.random.normal(k4, (C,), dtype=jnp.float32) * 0.02

    y = feedforward_pallas(x, w_fc, b_fc, w_proj, b_proj)
    jax.block_until_ready(y)

    y_ref = _reference(x, w_fc, b_fc, w_proj, b_proj)
    assert y.shape == (B, T, C)
    assert jnp.allclose(y, y_ref, atol=2e-3, rtol=2e-3), "mismatch vs reference"

    print("KERNEL_OK")
</pallas_src>

<mosaic_0001>
module attributes {stable_mosaic.version = 11 : i64} {
  func.func @_ffn_kernel(%arg0: i32, %arg1: i32, %arg2: memref<32x128xf32, #tpu.memory_space<vmem>>, %arg3: memref<128x512xf32, #tpu.memory_space<vmem>>, %arg4: memref<1x512xf32, #tpu.memory_space<vmem>>, %arg5: memref<512x128xf32, #tpu.memory_space<vmem>>, %arg6: memref<1x128xf32, #tpu.memory_space<vmem>>, %arg7: memref<32x128xf32, #tpu.memory_space<vmem>>, %arg8: memref<32x128xf32, #tpu.memory_space<vmem>>) attributes {dimension_semantics = [#tpu.dimension_semantics<parallel>, #tpu.dimension_semantics<arbitrary>], iteration_bounds = array<i64: 1, 1>, scalar_prefetch = 0 : i64, scratch_operands = 1 : i64, tpu.core_type = #tpu.core_type<tc>, window_params = [{transform_indices = @transform_0, window_bounds = array<i64: 32, 128>}, {transform_indices = @transform_1, window_bounds = array<i64: 128, 512>}, {transform_indices = @transform_2, window_bounds = array<i64: 1, 512>}, {transform_indices = @transform_3, window_bounds = array<i64: 512, 128>}, {pipeline_mode = #tpu.pipeline_mode<synchronous>, transform_indices = @transform_4, window_bounds = array<i64: 1, 128>}, {transform_indices = @transform_5, window_bounds = array<i64: 32, 128>}]} {
    %c0_i32 = arith.constant 0 : i32
    %0 = arith.cmpi eq, %arg1, %c0_i32 : i32
    %1 = arith.extui %0 : i1 to i32
    %c0_i32_0 = arith.constant 0 : i32
    %2 = arith.cmpi ne, %1, %c0_i32_0 : i32
    scf.if %2 {
      %cst_19 = arith.constant 0.000000e+00 : f32
      %30 = vector.broadcast %cst_19 : f32 to vector<32x128xf32>
      %c0_20 = arith.constant 0 : index
      %c0_21 = arith.constant 0 : index
      %31 = vector.load %arg8[%c0_20, %c0_21] : memref<32x128xf32, #tpu.memory_space<vmem>>, vector<32x128xf32>
      tpu.vector_store %arg8[%c0_20, %c0_21], %30 {strides = array<i32>} : memref<32x128xf32, #tpu.memory_space<vmem>>, vector<32x128xf32>,
    } else {
    }
    %c0 = arith.constant 0 : index
    %c0_1 = arith.constant 0 : index
    %3 = vector.load %arg2[%c0, %c0_1] : memref<32x128xf32, #tpu.memory_space<vmem>>, vector<32x128xf32>
    %c0_2 = arith.constant 0 : index
    %c0_3 = arith.constant 0 : index
    %4 = vector.load %arg3[%c0_2, %c0_3] : memref<128x512xf32, #tpu.memory_space<vmem>>, vector<128x512xf32>
    %cst = arith.constant dense<0.000000e+00> : vector<32x512xf32>
    %5 = tpu.matmul %3, %4, %cst {dimension_numbers = #tpu.dot_dimension_numbers<[1], [0], [0], [1], [0, 0, 1, 1], [], []>} : vector<32x128xf32>, vector<128x512xf32>, vector<32x512xf32> -> vector<32x512xf32>
    %c0_4 = arith.constant 0 : index
    %c0_5 = arith.constant 0 : index
    %6 = vector.load %arg4[%c0_4, %c0_5] : memref<1x512xf32, #tpu.memory_space<vmem>>, vector<1x512xf32>
    %7 = vector.broadcast %6 : vector<1x512xf32> to vector<32x512xf32>
    %8 = arith.addf %5, %7 : vector<32x512xf32>
    %cst_6 = arith.constant 5.000000e-01 : f32
    %9 = vector.broadcast %cst_6 : f32 to vector<32x512xf32>
    %10 = arith.mulf %9, %8 : vector<32x512xf32>
    %11 = arith.mulf %8, %8 : vector<32x512xf32>
    %12 = arith.mulf %11, %8 : vector<32x512xf32>
    %cst_7 = arith.constant 4.471500e-02 : f32
    %13 = vector.broadcast %cst_7 : f32 to vector<32x512xf32>
    %14 = arith.mulf %13, %12 : vector<32x512xf32>
    %15 = arith.addf %8, %14 : vector<32x512xf32>
    %cst_8 = arith.constant 0.797884583 : f32
    %16 = vector.broadcast %cst_8 : f32 to vector<32x512xf32>
    %17 = arith.mulf %16, %15 : vector<32x512xf32>
    %18 = math.tanh %17 : vector<32x512xf32>
    %cst_9 = arith.constant 1.000000e+00 : f32
    %19 = vector.broadcast %cst_9 : f32 to vector<32x512xf32>
    %20 = arith.addf %19, %18 : vector<32x512xf32>
    %21 = arith.mulf %10, %20 : vector<32x512xf32>
    %c0_10 = arith.constant 0 : index
    %c0_11 = arith.constant 0 : index
    %22 = vector.load %arg8[%c0_10, %c0_11] : memref<32x128xf32, #tpu.memory_space<vmem>>, vector<32x128xf32>
    %c0_12 = arith.constant 0 : index
    %c0_13 = arith.constant 0 : index
    %23 = vector.load %arg5[%c0_12, %c0_13] : memref<512x128xf32, #tpu.memory_space<vmem>>, vector<512x128xf32>
    %cst_14 = arith.constant dense<0.000000e+00> : vector<32x128xf32>
    %24 = tpu.matmul %21, %23, %cst_14 {dimension_numbers = #tpu.dot_dimension_numbers<[1], [0], [0], [1], [0, 0, 1, 1], [], []>} : vector<32x512xf32>, vector<512x128xf32>, vector<32x128xf32> -> vector<32x128xf32>
    %25 = arith.addf %22, %24 : vector<32x128xf32>
    %c0_15 = arith.constant 0 : index
    %c0_16 = arith.constant 0 : index
    %26 = vector.load %arg8[%c0_15, %c0_16] : memref<32x128xf32, #tpu.memory_space<vmem>>, vector<32x128xf32>
    tpu.vector_store %arg8[%c0_15, %c0_16], %25 {strides = array<i32>} : memref<32x128xf32, #tpu.memory_space<vmem>>, vector<32x128xf32>,
    %c0_i32_17 = arith.constant 0 : i32
    %27 = arith.cmpi eq, %arg1, %c0_i32_17 : i32
    %28 = arith.extui %27 : i1 to i32
    %c0_i32_18 = arith.constant 0 : i32
    %29 = arith.cmpi ne, %28, %c0_i32_18 : i32
    scf.if %29 {
      %c0_19 = arith.constant 0 : index
      %c0_20 = arith.constant 0 : index
      %30 = vector.load %arg8[%c0_19, %c0_20] : memref<32x128xf32, #tpu.memory_space<vmem>>, vector<32x128xf32>
      %c0_21 = arith.constant 0 : index
      %c0_22 = arith.constant 0 : index
      %31 = vector.load %arg6[%c0_21, %c0_22] : memref<1x128xf32, #tpu.memory_space<vmem>>, vector<1x128xf32>
      %32 = vector.broadcast %31 : vector<1x128xf32> to vector<32x128xf32>
      %33 = arith.addf %30, %32 : vector<32x128xf32>
      %c0_23 = arith.constant 0 : index
      %c0_24 = arith.constant 0 : index
      %34 = vector.load %arg7[%c0_23, %c0_24] : memref<32x128xf32, #tpu.memory_space<vmem>>, vector<32x128xf32>
      tpu.vector_store %arg7[%c0_23, %c0_24], %33 {strides = array<i32>} : memref<32x128xf32, #tpu.memory_space<vmem>>, vector<32x128xf32>,
    } else {
    }
    return
  }
  func.func @transform_0(%arg0: i32, %arg1: i32) -> (i32, i32) {
    %c0_i32 = arith.constant 0 : i32
    %c0_i32_0 = arith.constant 0 : i32
    return %arg0, %c0_i32 : i32, i32
  }
  func.func @transform_1(%arg0: i32, %arg1: i32) -> (i32, i32) {
    %c0_i32 = arith.constant 0 : i32
    %c0_i32_0 = arith.constant 0 : i32
    return %c0_i32, %arg1 : i32, i32
  }
  func.func @transform_2(%arg0: i32, %arg1: i32) -> (i32, i32) {
    %c0_i32 = arith.constant 0 : i32
    %c0_i32_0 = arith.constant 0 : i32
    return %c0_i32, %arg1 : i32, i32
  }
  func.func @transform_3(%arg0: i32, %arg1: i32) -> (i32, i32) {
    %c0_i32 = arith.constant 0 : i32
    %c0_i32_0 = arith.constant 0 : i32
    return %arg1, %c0_i32 : i32, i32
  }
  func.func @transform_4(%arg0: i32, %arg1: i32) -> (i32, i32) {
    %c0_i32 = arith.constant 0 : i32
    %c0_i32_0 = arith.constant 0 : i32
    %c0_i32_1 = arith.constant 0 : i32
    return %c0_i32, %c0_i32_0 : i32, i32
  }
  func.func @transform_5(%arg0: i32, %arg1: i32) -> (i32, i32) {
    %c0_i32 = arith.constant 0 : i32
    %c0_i32_0 = arith.constant 0 : i32
    return %arg0, %c0_i32 : i32, i32
  }
}

</mosaic_0001>

<bundles_post_ra>
// kernel: tpu_custom_call.1
= control target key start
LH: loop header
LB: loop body
LE: loop exit
PB: predicated region body
PF: predicated region fallthrough
CT: control target
= control target key end

     0   :  { %10 = vsyncpa [#allocation4], 0  ;;  %s1231_s0 = inlined_call_operand.hbm [shape: f32[32,128], index: 0, kind: input, shape index: {}]   ;;  %s1232_s1 = inlined_call_operand.hbm [shape: f32[128,512], index: 1, kind: input, shape index: {}]   ;;  %s1233_s2 = inlined_call_operand.hbm [shape: f32[1,512], index: 2, kind: input, shape index: {}]   ;;  %s1234_s3 = inlined_call_operand.hbm [shape: f32[512,128], index: 3, kind: input, shape index: {}]   ;;  %s1235_s4 = inlined_call_operand.vmem [shape: f32[1,128], index: 4, kind: input, shape index: {}]   ;;  %s1236_s5 = inlined_call_operand.hbm [shape: f32[32,128], index: 5, kind: output, shape index: {}]  }
   0x1   :  { %11 = vsyncpa [#allocation7], 0 }
   0x2   :  { %12 = vsyncpa [#allocation10], 0 }
   0x3   :  { %13 = vsyncpa [#allocation5], 0  ;;  %s1020_s18 = smov [#allocation6]  }
   0x4   :  { %s31_s19 = sshll.u32 %s1020_s18, 4  ;;  %s32_s19 = int_to_ptr.vmem [resolvable:$true] %s31_s19 }
   0x5   :  { %s920_s20 = scalar_lea.vmem %s32_s19, 8192  ;;  %p925_p1 = scmp.lt.s32.totalorder %s32_s19, %s32_s19 }
   0x6   :  { %p921_p0 = scmp.ne.s32.totalorder %s32_s19, %s920_s20  ;;  %p926_p2 = scmp.lt.s32.totalorder %s920_s20, %s920_s20 }
   0x8   :  { %p927_p3 = por %p926_p2, %p925_p1 }
   0xa   :  { %p928_p4 = pnand %p927_p3, %p921_p0 }
   0xc   :  { %931 = shalt.err (!%p928_p4)
}
   0xd   :  { %s1021_s21 = smov 512   ;;  %s1022_s22 = smov 32  }
   0xe   :  { %37 = dma.hbm_to_vmem [thread:$0]  %s1232_s1, 8192, %s32_s19, [#allocation7], %s1021_s21, %s1021_s21, %s1022_s22  }
   0xf   :  { %s1023_s25 = smov [#allocation3]  }
  0x10   :  { %s19_s26 = sshll.u32 %s1023_s25, 4  ;;  %s20_s26 = int_to_ptr.vmem [resolvable:$true] %s19_s26 }
  0x11   :  { %s940_s27 = scalar_lea.vmem %s20_s26, 512  ;;  %p945_p6 = scmp.lt.s32.totalorder %s20_s26, %s20_s26 }
  0x12   :  { %p941_p5 = scmp.ne.s32.totalorder %s20_s26, %s940_s27  ;;  %p946_p7 = scmp.lt.s32.totalorder %s940_s27, %s940_s27 }
  0x14   :  { %p947_p8 = por %p946_p7, %p945_p6 }
  0x16   :  { %p948_p9 = pnand %p947_p8, %p941_p5 }
  0x18   :  { %951 = shalt.err (!%p948_p9)
}
  0x19   :  { %s1024_s28 = smov 128   ;;  %s1025_s29 = smov 8  }
  0x1a   :  { %25 = dma.hbm_to_vmem [thread:$0]  %s1231_s0, 512, %s20_s26, [#allocation4], %s1024_s28, %s1024_s28, %s1025_s29  }
  0x1b   :  { %s1026_s1 = smov [#allocation8]   ;;  %s1027_s8 = smov [#allocation9]  }
  0x1c   :  { %s44_s7 = sshll.u32 %s1026_s1, 4  ;;  %s53_s9 = sshll.u32 %s1027_s8, 4  ;;  %s45_s7 = int_to_ptr.vmem [resolvable:$true] %s44_s7  ;;  %s54_s9 = int_to_ptr.vmem [resolvable:$true] %s53_s9 }
  0x1d   :  { %s960_s10 = scalar_lea.vmem %s45_s7, 64  ;;  %p965_p11 = scmp.lt.s32.totalorder %s45_s7, %s45_s7 }
  0x1e   :  { %p961_p10 = scmp.ne.s32.totalorder %s45_s7, %s960_s10  ;;  %p966_p12 = scmp.lt.s32.totalorder %s960_s10, %s960_s10 }
  0x20   :  { %p967_p13 = por %p966_p12, %p965_p11 }
  0x22   :  { %p968_p0 = pnand %p967_p13, %p961_p10 }
  0x24   :  { %971 = shalt.err (!%p968_p0)
}
  0x25   :  { %47 = dma.hbm_to_vmem [thread:$0]  %s1233_s2, 64, %s45_s7, [#allocation7]  }
  0x26   :  { %s980_s13 = scalar_lea.vmem %s54_s9, 8192  ;;  %p985_p2 = scmp.lt.s32.totalorder %s54_s9, %s54_s9 }
  0x27   :  { %p981_p1 = scmp.ne.s32.totalorder %s54_s9, %s980_s13  ;;  %p986_p3 = scmp.lt.s32.totalorder %s980_s13, %s980_s13 }
  0x29   :  { %p987_p4 = por %p986_p3, %p985_p2 }
  0x2b   :  { %p988_p5 = pnand %p987_p4, %p981_p1 }
  0x2d   :  { %991 = shalt.err (!%p988_p5)
}
  0x2e   :  { %59 = dma.hbm_to_vmem [thread:$0]  %s1234_s3, 8192, %s54_s9, [#allocation10], %s1024_s28, %s1024_s28, %s1025_s29  }
  0x2f   :  { %1012 = dma.done.wait [#allocation4], 512  }
  0x30   :  { %1013 = vsyncadd [#allocation4], 4294966784 }
  0x31   :  { %1014 = dma.done.wait [#allocation7], 8256  }
  0x32   :  { %1015 = vsyncadd [#allocation7], 4294959040 }
  0x33   :  { %1016 = dma.done.wait [#allocation10], 8192  }
  0x34   :  { %1017 = vsyncadd [#allocation10], 4294959104  ;;  %v1028_v0 = vmov 0.0   ;;  %v147_v1 = vld [vmem:[#allocation6 + $0x1e8] sm:$0xff]  ;;  %v149_v2 = vld [vmem:[#allocation6 + $0x1f8] sm:$0xff] }
  0x35   :  { %236 = vmatprep.mubr.f32.mxu0 %v1028_v0  ;;  %325 = vmatprep.mubr.f32.mxu1 %v1028_v0  ;;  %v146_v3 = vld [vmem:[#allocation6 + $0x1e0] sm:$0xff]  ;;  %v148_v4 = vld [vmem:[#allocation6 + $0x1f0] sm:$0xff]  ;;  %v143_v5 = vld [vmem:[#allocation6 + $0x1c8] sm:$0xff] }
  0x36   :  { %172 = vmatprep.subr.mxu0 %v147_v1  ;;  %261 = vmatprep.subr.mxu1 %v149_v2  ;;  %v145_v6 = vld [vmem:[#allocation6 + $0x1d8] sm:$0xff]  ;;  %v142_v7 = vld [vmem:[#allocation6 + $0x1c0] sm:$0xff]  ;;  %v144_v8 = vld [vmem:[#allocation6 + $0x1d0] sm:$0xff] }
  0x37   :  { %173 = vmatpush1.msra.mxu0 %v146_v3  ;;  %262 = vmatpush1.msra.mxu1 %v148_v4  ;;  %v139_v9 = vld [vmem:[#allocation6 + $0x1a8] sm:$0xff]  ;;  %v141_v10 = vld [vmem:[#allocation6 + $0x1b8] sm:$0xff]  ;;  %v138_v11 = vld [vmem:[#allocation6 + $0x1a0] sm:$0xff] }
  0x38   :  { %174 = vmatprep.subr.mxu0 %v143_v5  ;;  %263 = vmatprep.subr.mxu1 %v145_v6  ;;  %v140_v12 = vld [vmem:[#allocation6 + $0x1b0] sm:$0xff]  ;;  %v135_v13 = vld [vmem:[#allocation6 + $0x188] sm:$0xff]  ;;  %v137_v14 = vld [vmem:[#allocation6 + $0x198] sm:$0xff] }
  0x39   :  { %175 = vmatpush1.msra.mxu0 %v142_v7  ;;  %264 = vmatpush1.msra.mxu1 %v144_v8  ;;  %v134_v15 = vld [vmem:[#allocation6 + $0x180] sm:$0xff]  ;;  %v136_v16 = vld [vmem:[#allocation6 + $0x190] sm:$0xff]  ;;  %v131_v17 = vld [vmem:[#allocation6 + $0x168] sm:$0xff] }
  0x3a   :  { %176 = vmatprep.subr.mxu0 %v139_v9  ;;  %265 = vmatprep.subr.mxu1 %v141_v10  ;;  %v133_v18 = vld [vmem:[#allocation6 + $0x178] sm:$0xff]  ;;  %v130_v19 = vld [vmem:[#allocation6 + $0x160] sm:$0xff]  ;;  %v132_v20 = vld [vmem:[#allocation6 + $0x170] sm:$0xff] }
  0x3b   :  { %177 = vmatpush1.msra.mxu0 %v138_v11  ;;  %266 = vmatpush1.msra.mxu1 %v140_v12  ;;  %v127_v21 = vld [vmem:[#allocation6 + $0x148] sm:$0xff]  ;;  %v129_v22 = vld [vmem:[#allocation6 + $0x158] sm:$0xff]  ;;  %v126_v23 = vld [vmem:[#allocation6 + $0x140] sm:$0xff] }
  0x3c   :  { %178 = vmatprep.subr.mxu0 %v135_v13  ;;  %267 = vmatprep.subr.mxu1 %v137_v14  ;;  %v128_v24 = vld [vmem:[#allocation6 + $0x150] sm:$0xff]  ;;  %v123_v25 = vld [vmem:[#allocation6 + $0x128] sm:$0xff]  ;;  %v125_v26 = vld [vmem:[#allocation6 + $0x138] sm:$0xff] }
  0x3d   :  { %179 = vmatpush1.msra.mxu0 %v134_v15  ;;  %268 = vmatpush1.msra.mxu1 %v136_v16  ;;  %v122_v27 = vld [vmem:[#allocation6 + $0x120] sm:$0xff]  ;;  %v124_v28 = vld [vmem:[#allocation6 + $0x130] sm:$0xff]  ;;  %v119_v29 = vld [vmem:[#allocation6 + $0x108] sm:$0xff] }
  0x3e   :  { %180 = vmatprep.subr.mxu0 %v131_v17  ;;  %269 = vmatprep.subr.mxu1 %v133_v18  ;;  %v121_v30 = vld [vmem:[#allocation6 + $0x118] sm:$0xff]  ;;  %v118_v31 = vld [vmem:[#allocation6 + $0x100] sm:$0xff]  ;;  %v120_v32 = vld [vmem:[#allocation6 + $0x110] sm:$0xff] }
  0x3f   :  { %181 = vmatpush1.msra.mxu0 %v130_v19  ;;  %270 = vmatpush1.msra.mxu1 %v132_v20  ;;  %v115_v33 = vld [vmem:[#allocation6 + $0xe8] sm:$0xff]  ;;  %v117_v34 = vld [vmem:[#allocation6 + $0xf8] sm:$0xff]  ;;  %v114_v35 = vld [vmem:[#allocation6 + $0xe0] sm:$0xff] }
  0x40   :  { %182 = vmatprep.subr.mxu0 %v127_v21  ;;  %271 = vmatprep.subr.mxu1 %v129_v22  ;;  %v116_v36 = vld [vmem:[#allocation6 + $0xf0] sm:$0xff]  ;;  %v111_v37 = vld [vmem:[#allocation6 + $0xc8] sm:$0xff]  ;;  %v113_v38 = vld [vmem:[#allocation6 + $0xd8] sm:$0xff] }
  0x41   :  { %183 = vmatpush1.msra.mxu0 %v126_v23  ;;  %272 = vmatpush1.msra.mxu1 %v128_v24  ;;  %v110_v39 = vld [vmem:[#allocation6 + $0xc0] sm:$0xff]  ;;  %v112_v40 = vld [vmem:[#allocation6 + $0xd0] sm:$0xff]  ;;  %v107_v41 = vld [vmem:[#allocation6 + $0xa8] sm:$0xff] }
  0x42   :  { %184 = vmatprep.subr.mxu0 %v123_v25  ;;  %273 = vmatprep.subr.mxu1 %v125_v26  ;;  %v109_v42 = vld [vmem:[#allocation6 + $0xb8] sm:$0xff]  ;;  %v106_v43 = vld [vmem:[#allocation6 + $0xa0] sm:$0xff]  ;;  %v108_v44 = vld [vmem:[#allocation6 + $0xb0] sm:$0xff] }
  0x43   :  { %185 = vmatpush1.msra.mxu0 %v122_v27  ;;  %274 = vmatpush1.msra.mxu1 %v124_v28  ;;  %v103_v45 = vld [vmem:[#allocation6 + $0x88] sm:$0xff]  ;;  %v105_v46 = vld [vmem:[#allocation6 + $0x98] sm:$0xff]  ;;  %v102_v47 = vld [vmem:[#allocation6 + $0x80] sm:$0xff] }
  0x44   :  { %186 = vmatprep.subr.mxu0 %v119_v29  ;;  %275 = vmatprep.subr.mxu1 %v121_v30  ;;  %v104_v48 = vld [vmem:[#allocation6 + $0x90] sm:$0xff]  ;;  %v99_v49 = vld [vmem:[#allocation6 + $0x68] sm:$0xff]  ;;  %v101_v50 = vld [vmem:[#allocation6 + $0x78] sm:$0xff] }
  0x45   :  { %187 = vmatpush1.msra.mxu0 %v118_v31  ;;  %276 = vmatpush1.msra.mxu1 %v120_v32  ;;  %v98_v51 = vld [vmem:[#allocation6 + $0x60] sm:$0xff]  ;;  %v100_v52 = vld [vmem:[#allocation6 + $0x70] sm:$0xff]  ;;  %v95_v53 = vld [vmem:[#allocation6 + $0x48] sm:$0xff] }
  0x46   :  { %188 = vmatprep.subr.mxu0 %v115_v33  ;;  %277 = vmatprep.subr.mxu1 %v117_v34  ;;  %v97_v54 = vld [vmem:[#allocation6 + $0x58] sm:$0xff]  ;;  %v94_v55 = vld [vmem:[#allocation6 + $0x40] sm:$0xff]  ;;  %v96_v56 = vld [vmem:[#allocation6 + $0x50] sm:$0xff] }
  0x47   :  { %189 = vmatpush1.msra.mxu0 %v114_v35  ;;  %278 = vmatpush1.msra.mxu1 %v116_v36  ;;  %v91_v57 = vld [vmem:[#allocation6 + $0x28] sm:$0xff]  ;;  %v93_v58 = vld [vmem:[#allocation6 + $0x38] sm:$0xff]  ;;  %v90_v59 = vld [vmem:[#allocation6 + $0x20] sm:$0xff] }
  0x48   :  { %190 = vmatprep.subr.mxu0 %v111_v37  ;;  %279 = vmatprep.subr.mxu1 %v113_v38  ;;  %v92_v60 = vld [vmem:[#allocation6 + $0x30] sm:$0xff]  ;;  %v87_v61 = vld [vmem:[#allocation6 + $0x8] sm:$0xff]  ;;  %v89_v62 = vld [vmem:[#allocation6 + $0x18] sm:$0xff] }
  0x49   :  { %191 = vmatpush1.msra.mxu0 %v110_v39  ;;  %280 = vmatpush1.msra.mxu1 %v112_v40  ;;  %v86_v63 = vld [vmem:[#allocation6] sm:$0xff]  ;;  %v88_v1 = vld [vmem:[#allocation6 + $0x10] sm:$0xff]  ;;  %v83_v3 = vld [vmem:[#allocation3 + $0x8] sm:$0xff] }
  0x4a   :  { %192 = vmatprep.subr.mxu0 %v107_v41  ;;  %281 = vmatprep.subr.mxu1 %v109_v42  ;;  %v82_v2 = vld [vmem:[#allocation3] sm:$0xff]  ;;  %v84_v4 = vld [vmem:[#allocation3 + $0x10] sm:$0xff]  ;;  %v85_v5 = vld [vmem:[#allocation3 + $0x18] sm:$0xff] }
  0x4b   :  { %193 = vmatpush1.msra.mxu0 %v106_v43  ;;  %282 = vmatpush1.msra.mxu1 %v108_v44  ;;  %v529_v6 = vld [vmem:[#allocation9 + $0xf8] sm:$0xff]  ;;  %v528_v10 = vld [vmem:[#allocation9 + $0xf0] sm:$0xff]  ;;  %v559_v14 = vld [vmem:[#allocation9 + $0x1e8] sm:$0xff] }
  0x4c   :  { %194 = vmatprep.subr.mxu0 %v103_v45  ;;  %283 = vmatprep.subr.mxu1 %v105_v46  ;;  %v561_v7 = vld [vmem:[#allocation9 + $0x1f8] sm:$0xff]  ;;  %v560_v11 = vld [vmem:[#allocation9 + $0x1f0] sm:$0xff]  ;;  %v511_v15 = vld [vmem:[#allocation9 + $0x68] sm:$0xff] }
  0x4d   :  { %195 = vmatpush1.msra.mxu0 %v102_v47  ;;  %284 = vmatpush1.msra.mxu1 %v104_v48  ;;  %v513_v8 = vld [vmem:[#allocation9 + $0x78] sm:$0xff]  ;;  %v512_v12 = vld [vmem:[#allocation9 + $0x70] sm:$0xff]  ;;  %v543_v16 = vld [vmem:[#allocation9 + $0x168] sm:$0xff] }
  0x4e   :  { %196 = vmatprep.subr.mxu0 %v99_v49  ;;  %285 = vmatprep.subr.mxu1 %v101_v50  ;;  %v545_v9 = vld [vmem:[#allocation9 + $0x178] sm:$0xff]  ;;  %v544_v13 = vld [vmem:[#allocation9 + $0x170] sm:$0xff]  ;;  %v526_v17 = vld [vmem:[#allocation9 + $0xe0] sm:$0xff] }
  0x4f   :  { %197 = vmatpush1.msra.mxu0 %v98_v51  ;;  %286 = vmatpush1.msra.mxu1 %v100_v52  ;;  %v558_v18 = vld [vmem:[#allocation9 + $0x1e0] sm:$0xff]  ;;  %v525_v21 = vld [vmem:[#allocation9 + $0xd8] sm:$0xff]  ;;  %v524_v25 = vld [vmem:[#allocation9 + $0xd0] sm:$0xff] }
  0x50   :  { %198 = vmatprep.subr.mxu0 %v95_v53  ;;  %287 = vmatprep.subr.mxu1 %v97_v54  ;;  %v510_v19 = vld [vmem:[#allocation9 + $0x60] sm:$0xff]  ;;  %v557_v22 = vld [vmem:[#allocation9 + $0x1d8] sm:$0xff]  ;;  %v556_v26 = vld [vmem:[#allocation9 + $0x1d0] sm:$0xff] }
  0x51   :  { %199 = vmatpush1.msra.mxu0 %v94_v55  ;;  %288 = vmatpush1.msra.mxu1 %v96_v56  ;;  %v542_v20 = vld [vmem:[#allocation9 + $0x160] sm:$0xff]  ;;  %v509_v23 = vld [vmem:[#allocation9 + $0x58] sm:$0xff]  ;;  %v508_v27 = vld [vmem:[#allocation9 + $0x50] sm:$0xff] }
  0x52   :  { %200 = vmatprep.subr.mxu0 %v91_v57  ;;  %289 = vmatprep.subr.mxu1 %v93_v58  ;;  %v541_v24 = vld [vmem:[#allocation9 + $0x158] sm:$0xff]  ;;  %v540_v28 = vld [vmem:[#allocation9 + $0x150] sm:$0xff]  ;;  %v523_v29 = vld [vmem:[#allocation9 + $0xc8] sm:$0xff] }
  0x53   :  { %201 = vmatpush1.msra.mxu0 %v90_v59  ;;  %290 = vmatpush1.msra.mxu1 %v92_v60  ;;  %v555_v30 = vld [vmem:[#allocation9 + $0x1c8] sm:$0xff]  ;;  %v522_v33 = vld [vmem:[#allocation9 + $0xc0] sm:$0xff]  ;;  %v521_v37 = vld [vmem:[#allocation9 + $0xb8] sm:$0xff] }
  0x54   :  { %202 = vmatprep.subr.mxu0 %v87_v61  ;;  %291 = vmatprep.subr.mxu1 %v89_v62  ;;  %v507_v31 = vld [vmem:[#allocation9 + $0x48] sm:$0xff]  ;;  %v554_v34 = vld [vmem:[#allocation9 + $0x1c0] sm:$0xff]  ;;  %v553_v38 = vld [vmem:[#allocation9 + $0x1b8] sm:$0xff] }
  0x55   :  { %203 = vmatpush1.msra.mxu0 %v86_v63  ;;  %292 = vmatpush1.msra.mxu1 %v88_v1  ;;  %v539_v32 = vld [vmem:[#allocation9 + $0x148] sm:$0xff]  ;;  %v506_v35 = vld [vmem:[#allocation9 + $0x40] sm:$0xff]  ;;  %v505_v39 = vld [vmem:[#allocation9 + $0x38] sm:$0xff] }
  0x56   :  { %237 = vmatmul.mubr.f32.vlgmr.msra.gmra.mxu0 %v82_v2  ;;  %326 = vmatmul.mubr.f32.vlgmr.msra.gmra.mxu1 %v82_v2  ;;  %v538_v36 = vld [vmem:[#allocation9 + $0x140] sm:$0xff]  ;;  %v537_v40 = vld [vmem:[#allocation9 + $0x138] sm:$0xff]  ;;  %v520_v41 = vld [vmem:[#allocation9 + $0xb0] sm:$0xff] }
  0x57   :  { %242 = vmatprep.mubr.f32.mxu0 %v1028_v0  ;;  %331 = vmatprep.mubr.f32.mxu1 %v1028_v0  ;;  %v552_v42 = vld [vmem:[#allocation9 + $0x1b0] sm:$0xff]  ;;  %v519_v45 = vld [vmem:[#allocation9 + $0xa8] sm:$0xff]  ;;  %v518_v49 = vld [vmem:[#allocation9 + $0xa0] sm:$0xff] }
  0x58   :  { %782 = vmatprep.subr.mxu0 %v529_v6  ;;  %826 = vmatprep.subr.mxu1 %v561_v7  ;;  %v504_v43 = vld [vmem:[#allocation9 + $0x30] sm:$0xff]  ;;  %v551_v46 = vld [vmem:[#allocation9 + $0x1a8] sm:$0xff]  ;;  %v550_v50 = vld [vmem:[#allocation9 + $0x1a0] sm:$0xff]  ;;  %v152_v6 = vlaneseq }
  0x59   :  { %783 = vmatpush3.msra.mxu0 %v513_v8  ;;  %827 = vmatpush3.msra.mxu1 %v545_v9  ;;  %v536_v44 = vld [vmem:[#allocation9 + $0x130] sm:$0xff]  ;;  %v503_v47 = vld [vmem:[#allocation9 + $0x28] sm:$0xff]  ;;  %v502_v51 = vld [vmem:[#allocation9 + $0x20] sm:$0xff] }
  0x5a   :  { %243 = vmatmul.mubr.f32.gmra.mxu0 %v83_v3  ;;  %332 = vmatmul.mubr.f32.gmra.mxu1 %v83_v3  ;;  %v535_v48 = vld [vmem:[#allocation9 + $0x128] sm:$0xff]  ;;  %v534_v52 = vld [vmem:[#allocation9 + $0x120] sm:$0xff]  ;;  %v517_v53 = vld [vmem:[#allocation9 + $0x98] sm:$0xff]  ;;  %v153_v7 = vshrl.u32 %v152_v6, 7 }
  0x5b   :  { %248 = vmatprep.mubr.f32.mxu0 %v1028_v0  ;;  %337 = vmatprep.mubr.f32.mxu1 %v1028_v0  ;;  %v549_v54 = vld [vmem:[#allocation9 + $0x198] sm:$0xff]  ;;  %v516_v57 = vld [vmem:[#allocation9 + $0x90] sm:$0xff]  ;;  %v515_v61 = vld [vmem:[#allocation9 + $0x88] sm:$0xff] }
  0x5c   :  { %784 = vmatprep.subr.mxu0 %v528_v10  ;;  %828 = vmatprep.subr.mxu1 %v560_v11  ;;  %v501_v55 = vld [vmem:[#allocation9 + $0x18] sm:$0xff]  ;;  %v548_v58 = vld [vmem:[#allocation9 + $0x190] sm:$0xff]  ;;  %v547_v62 = vld [vmem:[#allocation9 + $0x188] sm:$0xff]  ;;  %v154_v8 = vsub.s32 0, %v153_v7  ;;  %v162_v9 = vsub.s32 2, %v153_v7  ;;  %v158_v11 = vsub.s32 1, %v153_v7 }
  0x5d   :  { %785 = vmatpush3.msra.mxu0 %v512_v12  ;;  %829 = vmatpush3.msra.mxu1 %v544_v13  ;;  %v533_v56 = vld [vmem:[#allocation9 + $0x118] sm:$0xff]  ;;  %v500_v59 = vld [vmem:[#allocation9 + $0x10] sm:$0xff]  ;;  %v499_v63 = vld [vmem:[#allocation9 + $0x8] sm:$0xff]  ;;  %v166_v12 = vsub.s32 3, %v153_v7 }
  0x5e   :  { %249 = vmatmul.mubr.f32.gmra.mxu0 %v84_v4  ;;  %338 = vmatmul.mubr.f32.gmra.mxu1 %v84_v4  ;;  %v532_v60 = vld [vmem:[#allocation9 + $0x110] sm:$0xff]  ;;  %v531_v1 = vld [vmem:[#allocation9 + $0x108] sm:$0xff]  ;;  %v514_v2 = vld [vmem:[#allocation9 + $0x80] sm:$0xff] }
  0x5f   :  { %254 = vmatprep.mubr.f32.mxu0 %v1028_v0  ;;  %343 = vmatprep.mubr.f32.mxu1 %v1028_v0  ;;  %v527_v0 = vld [vmem:[#allocation9 + $0xe8] sm:$0xff]  ;;  %v546_v3 = vld [vmem:[#allocation9 + $0x180] sm:$0xff]  ;;  %v150_v10 = vld [vmem:[#allocation8] sm:$0xf] }
  0x60   :  { %786 = vmatprep.subr.mxu0 %v527_v0  ;;  %830 = vmatprep.subr.mxu1 %v559_v14  ;;  %v498_v4 = vld [vmem:[#allocation9] sm:$0xff]  ;;  %v1086_v13 = vrot.slane %v150_v10, %v154_v8  ;;  %v1088_v0 = vrot.slane %v150_v10, %v162_v9 }
  0x61   :  { %787 = vmatpush3.msra.mxu0 %v511_v15  ;;  %831 = vmatpush3.msra.mxu1 %v543_v16  ;;  %v1090_v16 = vrot.slane %v150_v10, %v158_v11 }
  0x62   :  { %255 = vmatmul.mubr.f32.gmra.mxu0 %v85_v5  ;;  %344 = vmatmul.mubr.f32.gmra.mxu1 %v85_v5  ;;  %v530_v5 = vld [vmem:[#allocation9 + $0x100] sm:$0xff] }
  0x63   :  { %788 = vmatprep.subr.mxu0 %v526_v17  ;;  %832 = vmatprep.subr.mxu1 %v558_v18  ;;  %v1092_v17 = vrot.slane %v150_v10, %v166_v12 }
  0x64   :  { %789 = vmatpush3.msra.mxu0 %v510_v19  ;;  %833 = vmatpush3.msra.mxu1 %v542_v20 }
  0x65   :  { %790 = vmatprep.subr.mxu0 %v525_v21  ;;  %834 = vmatprep.subr.mxu1 %v557_v22 }
  0x66   :  { %791 = vmatpush3.msra.mxu0 %v509_v23  ;;  %835 = vmatpush3.msra.mxu1 %v541_v24 }
  0x67   :  { %792 = vmatprep.subr.mxu0 %v524_v25  ;;  %836 = vmatprep.subr.mxu1 %v556_v26 }
  0x68   :  { %793 = vmatpush3.msra.mxu0 %v508_v27  ;;  %837 = vmatpush3.msra.mxu1 %v540_v28 }
  0x69   :  { %794 = vmatprep.subr.mxu0 %v523_v29  ;;  %838 = vmatprep.subr.mxu1 %v555_v30 }
  0x6a   :  { %795 = vmatpush3.msra.mxu0 %v507_v31  ;;  %839 = vmatpush3.msra.mxu1 %v539_v32 }
  0x6b   :  { %796 = vmatprep.subr.mxu0 %v522_v33  ;;  %840 = vmatprep.subr.mxu1 %v554_v34 }
  0x6c   :  { %797 = vmatpush3.msra.mxu0 %v506_v35  ;;  %841 = vmatpush3.msra.mxu1 %v538_v36 }
  0x6d   :  { %798 = vmatprep.subr.mxu0 %v521_v37  ;;  %842 = vmatprep.subr.mxu1 %v553_v38 }
  0x6e   :  { %799 = vmatpush3.msra.mxu0 %v505_v39  ;;  %843 = vmatpush3.msra.mxu1 %v537_v40 }
  0x6f   :  { %800 = vmatprep.subr.mxu0 %v520_v41  ;;  %844 = vmatprep.subr.mxu1 %v552_v42 }
  0x70   :  { %801 = vmatpush3.msra.mxu0 %v504_v43  ;;  %845 = vmatpush3.msra.mxu1 %v536_v44 }
  0x71   :  { %802 = vmatprep.subr.mxu0 %v519_v45  ;;  %846 = vmatprep.subr.mxu1 %v551_v46 }
  0x72   :  { %803 = vmatpush3.msra.mxu0 %v503_v47  ;;  %847 = vmatpush3.msra.mxu1 %v535_v48 }
  0x73   :  { %804 = vmatprep.subr.mxu0 %v518_v49  ;;  %848 = vmatprep.subr.mxu1 %v550_v50 }
  0x74   :  { %805 = vmatpush3.msra.mxu0 %v502_v51  ;;  %849 = vmatpush3.msra.mxu1 %v534_v52 }
  0x75   :  { %806 = vmatprep.subr.mxu0 %v517_v53  ;;  %850 = vmatprep.subr.mxu1 %v549_v54 }
  0x76   :  { %807 = vmatpush3.msra.mxu0 %v501_v55  ;;  %851 = vmatpush3.msra.mxu1 %v533_v56 }
  0x77   :  { %808 = vmatprep.subr.mxu0 %v516_v57  ;;  %852 = vmatprep.subr.mxu1 %v548_v58 }
  0x78   :  { %809 = vmatpush3.msra.mxu0 %v500_v59  ;;  %853 = vmatpush3.msra.mxu1 %v532_v60 }
  0x79   :  { %810 = vmatprep.subr.mxu0 %v515_v61  ;;  %854 = vmatprep.subr.mxu1 %v547_v62 }
  0x7a   :  { %811 = vmatpush3.msra.mxu0 %v499_v63  ;;  %855 = vmatpush3.msra.mxu1 %v531_v1 }
  0x7b   :  { %812 = vmatprep.subr.mxu0 %v514_v2  ;;  %856 = vmatprep.subr.mxu1 %v546_v3 }
  0x7c   :  { %813 = vmatpush3.msra.mxu0 %v498_v4  ;;  %857 = vmatpush3.msra.mxu1 %v530_v5 }
 0x116   :  { %v238_v14 = vpop.f32.mrf.mxu0  ;;  %v327_v15 = vpop.f32.mrf.mxu1 }
 0x117   :  { %v1095_v18 = vadd.f32 %v238_v14, %v1086_v13  ;;  %v1098_v19 = vadd.f32 %v327_v15, %v1088_v0 }
 0x118   :  { %v240_v20 = vpop.f32.mrf.mxu0  ;;  %v329_v21 = vpop.f32.mrf.mxu1 }
 0x119   :  { %v366_v22 = vmul.f32 %v1095_v18, %v1095_v18  ;;  %v368_v23 = vmul.f32 %v1098_v19, %v1098_v19  ;;  %v1105_v24 = vadd.f32 %v240_v20, %v1090_v16  ;;  %v1108_v25 = vadd.f32 %v329_v21, %v1092_v17 }
 0x11a   :  { %v244_v26 = vpop.f32.mrf.mxu0  ;;  %v333_v27 = vpop.f32.mrf.mxu1 }
 0x11b   :  { %v382_v28 = vmul.f32 %v366_v22, %v1095_v18  ;;  %v384_v29 = vmul.f32 %v368_v23, %v1098_v19  ;;  %v1113_v30 = vadd.f32 %v244_v26, %v1086_v13  ;;  %v1116_v31 = vadd.f32 %v333_v27, %v1088_v0 }
 0x11c   :  { %v367_v32 = vmul.f32 %v1105_v24, %v1105_v24  ;;  %v369_v33 = vmul.f32 %v1108_v25, %v1108_v25  ;;  %v246_v34 = vpop.f32.mrf.mxu0  ;;  %v335_v35 = vpop.f32.mrf.mxu1 }
 0x11d   :  { %v398_v36 = vmul.f32 0.044715, %v382_v28  ;;  %v400_v37 = vmul.f32 0.044715, %v384_v29  ;;  %v370_v38 = vmul.f32 %v1113_v30, %v1113_v30  ;;  %v372_v39 = vmul.f32 %v1116_v31, %v1116_v31 }
 0x11e   :  { %v383_v40 = vmul.f32 %v367_v32, %v1105_v24  ;;  %v385_v41 = vmul.f32 %v369_v33, %v1108_v25  ;;  %v1129_v42 = vadd.f32 %v246_v34, %v1090_v16  ;;  %v1132_v43 = vadd.f32 %v335_v35, %v1092_v17  ;;  %v250_v44 = vpop.f32.mrf.mxu0  ;;  %v339_v45 = vpop.f32.mrf.mxu1 }
 0x11f   :  { %v414_v46 = vadd.f32 %v398_v36, %v1095_v18  ;;  %v416_v47 = vadd.f32 %v400_v37, %v1098_v19  ;;  %v386_v48 = vmul.f32 %v370_v38, %v1113_v30  ;;  %v388_v56 = vmul.f32 %v372_v39, %v1116_v31 }
 0x120   :  { %v399_v49 = vmul.f32 0.044715, %v383_v40  ;;  %v401_v50 = vmul.f32 0.044715, %v385_v41  ;;  %v371_v51 = vmul.f32 %v1129_v42, %v1129_v42  ;;  %v373_v52 = vmul.f32 %v1132_v43, %v1132_v43  ;;  %v252_v53 = vpop.f32.mrf.mxu0  ;;  %v341_v54 = vpop.f32.mrf.mxu1 }
 0x121   :  { %v430_v55 = vmul.f32 0.7978846, %v414_v46  ;;  %v1143_v57 = vadd.f32 %v250_v44, %v1086_v13  ;;  %v402_v58 = vmul.f32 0.044715, %v386_v48  ;;  %v432_v60 = vmul.f32 0.7978846, %v416_v47 }
 0x122   :  { %v387_v59 = vmul.f32 %v371_v51, %v1129_v42  ;;  %v415_v61 = vadd.f32 %v399_v49, %v1105_v24  ;;  %v389_v62 = vmul.f32 %v373_v52, %v1132_v43  ;;  %v417_v1 = vadd.f32 %v401_v50, %v1108_v25  ;;  %v256_v2 = vpop.f32.mrf.mxu0  ;;  %v345_v3 = vpop.f32.mrf.mxu1 }
 0x123   :  { %v374_v63 = vmul.f32 %v1143_v57, %v1143_v57  ;;  %880 = vtanh.f32 %v430_v55  ;;  %v404_v4 = vmul.f32 0.044715, %v388_v56  ;;  %v418_v7 = vadd.f32 %v402_v58, %v1113_v30 }
 0x124   :  { %v403_v5 = vmul.f32 0.044715, %v387_v59  ;;  %v405_v6 = vmul.f32 0.044715, %v389_v62  ;;  %v1153_v8 = vadd.f32 %v339_v45, %v1088_v0  ;;  %v1156_v9 = vadd.f32 %v252_v53, %v1090_v16  ;;  %v258_v23 = vpop.f32.mrf.mxu0  ;;  %v347_v26 = vpop.f32.mrf.mxu1 }
 0x125   :  { %v1159_v10 = vadd.f32 %v341_v54, %v1092_v17  ;;  %882 = vtanh.f32 %v432_v60  ;;  %v431_v11 = vmul.f32 0.7978846, %v415_v61  ;;  %v390_v12 = vmul.f32 %v374_v63, %v1143_v57 }
 0x126   :  { %v1163_v14 = vadd.f32 %v256_v2, %v1086_v13  ;;  %v376_v15 = vmul.f32 %v1153_v8, %v1153_v8  ;;  %v375_v20 = vmul.f32 %v1156_v9, %v1156_v9  ;;  %v1172_v22 = vadd.f32 %v345_v3, %v1088_v0 }
 0x127   :  { %v377_v21 = vmul.f32 %v1159_v10, %v1159_v10  ;;  %v433_v27 = vmul.f32 0.7978846, %v417_v1  ;;  %v419_v28 = vadd.f32 %v403_v5, %v1129_v42  ;;  %v421_v13 = vadd.f32 %v405_v6, %v1132_v43 }
 0x128   :  { %v378_v29 = vmul.f32 %v1163_v14, %v1163_v14  ;;  %v392_v32 = vmul.f32 %v376_v15, %v1153_v8  ;;  %v391_v33 = vmul.f32 %v375_v20, %v1156_v9  ;;  %v380_v0 = vmul.f32 %v1172_v22, %v1172_v22 }
 0x129   :  { %v393_v34 = vmul.f32 %v377_v21, %v1159_v10  ;;  %v420_v35 = vadd.f32 %v404_v4, %v1116_v31  ;;  %v406_v36 = vmul.f32 0.044715, %v390_v12  ;;  %v1185_v37 = vadd.f32 %v258_v23, %v1090_v16 }
 0x12a   :  { %v1188_v38 = vadd.f32 %v347_v26, %v1092_v17  ;;  %v408_v39 = vmul.f32 0.044715, %v392_v32  ;;  %v407_v40 = vmul.f32 0.044715, %v391_v33  ;;  %v394_v44 = vmul.f32 %v378_v29, %v1163_v14 }
 0x12b   :  { %v409_v41 = vmul.f32 0.044715, %v393_v34  ;;  %v396_v45 = vmul.f32 %v380_v0, %v1172_v22  ;;  %v379_v46 = vmul.f32 %v1185_v37, %v1185_v37  ;;  %884 = vtanh.f32 %v431_v11 }
 0x12c   :  { %v381_v47 = vmul.f32 %v1188_v38, %v1188_v38  ;;  %v435_v48 = vmul.f32 0.7978846, %v419_v28  ;;  %v437_v16 = vmul.f32 0.7978846, %v421_v13  ;;  %v423_v49 = vadd.f32 %v407_v40, %v1156_v9 }
 0x12d   :  { %v425_v17 = vadd.f32 %v409_v41, %v1159_v10  ;;  %v395_v50 = vmul.f32 %v379_v46, %v1185_v37  ;;  %886 = vtanh.f32 %v433_v27  ;;  %v434_v52 = vmul.f32 0.7978846, %v418_v7 }
 0x12e   :  { %v397_v51 = vmul.f32 %v381_v47, %v1188_v38  ;;  %v422_v53 = vadd.f32 %v406_v36, %v1143_v57  ;;  %v410_v54 = vmul.f32 0.044715, %v394_v44  ;;  %v436_v55 = vmul.f32 0.7978846, %v420_v35 }
 0x12f   :  { %v424_v56 = vadd.f32 %v408_v39, %v1153_v8  ;;  %v412_v58 = vmul.f32 0.044715, %v396_v45  ;;  %v411_v59 = vmul.f32 0.044715, %v395_v50  ;;  %v439_v61 = vmul.f32 0.7978846, %v423_v49 }
 0x130   :  { %v881_v60 = vpop.eup %880  ;;  %v413_v62 = vmul.f32 0.044715, %v397_v51  ;;  %888 = vtanh.f32 %v435_v48  ;;  %v441_v63 = vmul.f32 0.7978846, %v425_v17  ;;  %v438_v3 = vmul.f32 0.7978846, %v422_v53 }
 0x131   :  { %v427_v1 = vadd.f32 %v411_v59, %v1185_v37  ;;  %890 = vtanh.f32 %v437_v16  ;;  %v426_v4 = vadd.f32 %v410_v54, %v1163_v14  ;;  %v440_v6 = vmul.f32 0.7978846, %v424_v56 }
 0x132   :  { %v883_v2 = vpop.eup %882  ;;  %v429_v5 = vadd.f32 %v413_v62, %v1188_v38  ;;  %892 = vtanh.f32 %v434_v52  ;;  %v428_v7 = vadd.f32 %v412_v58, %v1172_v22  ;;  %v462_v23 = vadd.f32 1.0, %v881_v60 }
 0x133   :  { %894 = vtanh.f32 %v436_v55  ;;  %v443_v11 = vmul.f32 0.7978846, %v427_v1  ;;  %v442_v15 = vmul.f32 0.7978846, %v426_v4  ;;  %v351_v26 = vmul.f32 0.5, %v1105_v24 }
 0x134   :  { %896 = vtanh.f32 %v439_v61  ;;  %v445_v12 = vmul.f32 0.7978846, %v429_v5  ;;  %v444_v20 = vmul.f32 0.7978846, %v428_v7  ;;  %v350_v13 = vmul.f32 0.5, %v1095_v18 }
 0x135   :  { %898 = vtanh.f32 %v441_v63  ;;  %v464_v29 = vadd.f32 1.0, %v883_v2  ;;  %v353_v33 = vmul.f32 0.5, %v1108_v25  ;;  %v352_v35 = vmul.f32 0.5, %v1098_v19 }
 0x136   :  { %900 = vtanh.f32 %v438_v3  ;;  %v478_v0 = vmul.f32 %v462_v23, %v350_v13  ;;  %v355_v41 = vmul.f32 0.5, %v1129_v42  ;;  %v357_v45 = vmul.f32 0.5, %v1132_v43 }
 0x137   :  { %902 = vtanh.f32 %v440_v6  ;;  %v480_v24 = vmul.f32 %v464_v29, %v352_v35  ;;  %v354_v48 = vmul.f32 0.5, %v1113_v30  ;;  %v356_v17 = vmul.f32 0.5, %v1116_v31 }
 0x138   :  { %v885_v21 = vpop.eup %884  ;;  %904 = vtanh.f32 %v443_v11  ;;  %v359_v52 = vmul.f32 0.5, %v1156_v9  ;;  %v361_v55 = vmul.f32 0.5, %v1159_v10  ;;  %v358_v59 = vmul.f32 0.5, %v1143_v57 }
 0x139   :  { %v463_v27 = vadd.f32 1.0, %v885_v21  ;;  %906 = vtanh.f32 %v445_v12  ;;  %v360_v62 = vmul.f32 0.5, %v1153_v8  ;;  %v363_v2 = vmul.f32 0.5, %v1185_v37 }
 0x13a   :  { %v887_v28 = vpop.eup %886  ;;  %908 = vtanh.f32 %v442_v15  ;;  %v365_v5 = vmul.f32 0.5, %v1188_v38  ;;  %v362_v11 = vmul.f32 0.5, %v1163_v14  ;;  %v364_v15 = vmul.f32 0.5, %v1172_v22  ;;  %v781_v14 = vld [vmem:[%s1235_s4] ss:$0 sm:$0xff]  ;;  %s1029_s4 = smov [#allocation11]  }
 0x13b   :  { %v479_v32 = vmul.f32 %v463_v27, %v351_v26  ;;  %v465_v34 = vadd.f32 1.0, %v887_v28  ;;  %910 = vtanh.f32 %v444_v20  ;;  %s767_s15 = sshll.u32 %s1029_s4, 4  ;;  %s768_s15 = int_to_ptr.vmem [resolvable:$true] %s767_s15 }
 0x13c   :  { %s992_s16 = scalar_lea.vmem %s768_s15, 512  ;;  %p997_p7 = scmp.lt.s32.totalorder %s768_s15, %s768_s15 }
 0x13d   :  { %v889_v36 = vpop.eup %888  ;;  %626 = vmatprep.mubr.f32.mxu0 %v479_v32  ;;  %v481_v39 = vmul.f32 %v465_v34, %v353_v33  ;;  %p993_p6 = scmp.ne.s32.totalorder %s768_s15, %s992_s16  ;;  %p998_p8 = scmp.lt.s32.totalorder %s992_s16, %s992_s16 }
 0x13e   :  { %v891_v40 = vpop.eup %890  ;;  %627 = vmatmul.mubr.f32.vlgmr.msra.gmra.mxu0 %v478_v0  ;;  %v467_v44 = vadd.f32 1.0, %v889_v36 }
 0x13f   :  { %v893_v18 = vpop.eup %892  ;;  %711 = vmatprep.mubr.f32.mxu1 %v481_v39  ;;  %v469_v46 = vadd.f32 1.0, %v891_v40  ;;  %p999_p9 = por %p998_p8, %p997_p7 }
 0x140   :  { %v895_v25 = vpop.eup %894  ;;  %712 = vmatmul.mubr.f32.vlgmr.msra.gmra.mxu1 %v480_v24  ;;  %v483_v47 = vmul.f32 %v467_v44, %v355_v41  ;;  %v466_v19 = vadd.f32 1.0, %v893_v18 }
 0x141   :  { %v897_v16 = vpop.eup %896  ;;  %v485_v49 = vmul.f32 %v469_v46, %v357_v45  ;;  %v468_v50 = vadd.f32 1.0, %v895_v25  ;;  %p1000_p10 = pnand %p999_p9, %p993_p6 }
 0x142   :  { %v899_v51 = vpop.eup %898  ;;  %631 = vmatprep.mubr.f32.mxu0 %v483_v47  ;;  %v482_v42 = vmul.f32 %v466_v19, %v354_v48  ;;  %v471_v53 = vadd.f32 1.0, %v897_v16 }
 0x143   :  { %v901_v54 = vpop.eup %900  ;;  %716 = vmatprep.mubr.f32.mxu1 %v485_v49  ;;  %v484_v43 = vmul.f32 %v468_v50, %v356_v17  ;;  %v473_v56 = vadd.f32 1.0, %v899_v51 }
 0x144   :  { %v903_v58 = vpop.eup %902  ;;  %632 = vmatmul.mubr.f32.gmra.mxu0 %v482_v42  ;;  %v487_v30 = vmul.f32 %v471_v53, %v359_v52  ;;  %v470_v60 = vadd.f32 1.0, %v901_v54 }
 0x145   :  { %v905_v31 = vpop.eup %904  ;;  %717 = vmatmul.mubr.f32.gmra.mxu1 %v484_v43  ;;  %v489_v61 = vmul.f32 %v473_v56, %v361_v55  ;;  %v472_v63 = vadd.f32 1.0, %v903_v58 }
 0x146   :  { %v907_v9 = vpop.eup %906  ;;  %636 = vmatprep.mubr.f32.mxu0 %v487_v30  ;;  %v486_v1 = vmul.f32 %v470_v60, %v358_v59  ;;  %v475_v3 = vadd.f32 1.0, %v905_v31 }
 0x147   :  { %v909_v10 = vpop.eup %908  ;;  %721 = vmatprep.mubr.f32.mxu1 %v489_v61  ;;  %v488_v4 = vmul.f32 %v472_v63, %v360_v62  ;;  %v477_v6 = vadd.f32 1.0, %v907_v9 }
 0x148   :  { %v911_v57 = vpop.eup %910  ;;  %637 = vmatmul.mubr.f32.gmra.mxu0 %v486_v1  ;;  %v491_v7 = vmul.f32 %v475_v3, %v363_v2  ;;  %v474_v12 = vadd.f32 1.0, %v909_v10 }
 0x149   :  { %722 = vmatmul.mubr.f32.gmra.mxu1 %v488_v4  ;;  %v493_v8 = vmul.f32 %v477_v6, %v365_v5  ;;  %v476_v20 = vadd.f32 1.0, %v911_v57 }
 0x14a   :  { %641 = vmatprep.mubr.f32.mxu0 %v491_v7  ;;  %v490_v37 = vmul.f32 %v474_v12, %v362_v11 }
 0x14b   :  { %726 = vmatprep.mubr.f32.mxu1 %v493_v8  ;;  %v492_v21 = vmul.f32 %v476_v20, %v364_v15 }
 0x14c   :  { %642 = vmatmul.mubr.f32.gmra.mxu0 %v490_v37 }
 0x14d   :  { %727 = vmatmul.mubr.f32.gmra.mxu1 %v492_v21 }
 0x1fe   :  { %v814_v23 = vpop.f32.mrf.mxu0 }
 0x200   :  { %v858_v38 = vpop.f32.mrf.mxu1  ;;  %v815_v26 = vpop.f32.mrf.mxu0 }
 0x201   :  { %v816_v27 = vadd.f32 %v815_v26, %v814_v23 }
 0x202   :  { %v859_v28 = vpop.f32.mrf.mxu1 }
 0x203   :  { %v860_v13 = vadd.f32 %v859_v28, %v858_v38 }
 0x204   :  { %v817_v29 = vpop.f32.mrf.mxu0 }
 0x205   :  { %v714_v32 = vadd.f32 %v860_v13, %v816_v27  ;;  %v861_v22 = vpop.f32.mrf.mxu1 }
 0x206   :  { %v818_v33 = vpop.f32.mrf.mxu0 }
 0x207   :  { %v754_v34 = vadd.f32 %v781_v14, %v714_v32  ;;  %v819_v0 = vadd.f32 %v818_v33, %v817_v29  ;;  %v862_v35 = vpop.f32.mrf.mxu1 }
 0x208   :  { %v863_v36 = vadd.f32 %v862_v35, %v861_v22  ;;  %v820_v39 = vpop.f32.mrf.mxu0 }
 0x209   :  { %758 = vst [vmem:[#allocation11] sm:$0xff] %v754_v34  ;;  %v864_v40 = vpop.f32.mrf.mxu1 }
 0x20a   :  { %v719_v24 = vadd.f32 %v863_v36, %v819_v0  ;;  %v821_v41 = vpop.f32.mrf.mxu0 }
 0x20b   :  { %v822_v44 = vadd.f32 %v821_v41, %v820_v39  ;;  %v865_v18 = vpop.f32.mrf.mxu1 }
 0x20c   :  { %v755_v45 = vadd.f32 %v781_v14, %v719_v24  ;;  %v866_v46 = vadd.f32 %v865_v18, %v864_v40  ;;  %v823_v25 = vpop.f32.mrf.mxu0 }
 0x20d   :  { %v867_v47 = vpop.f32.mrf.mxu1 }
 0x20e   :  { %759 = vst [vmem:[#allocation11 + $0x8] sm:$0xff] %v755_v45  ;;  %v724_v48 = vadd.f32 %v866_v46, %v822_v44  ;;  %v824_v19 = vpop.f32.mrf.mxu0 }
 0x20f   :  { %v825_v16 = vadd.f32 %v824_v19, %v823_v25  ;;  %v868_v49 = vpop.f32.mrf.mxu1 }
 0x210   :  { %v756_v17 = vadd.f32 %v781_v14, %v724_v48  ;;  %v869_v50 = vadd.f32 %v868_v49, %v867_v47 }
 0x212   :  { %760 = vst [vmem:[#allocation11 + $0x10] sm:$0xff] %v756_v17  ;;  %v729_v51 = vadd.f32 %v869_v50, %v825_v16 }
 0x214   :  { %v757_v42 = vadd.f32 %v781_v14, %v729_v51 }
 0x216   :  { %761 = vst [vmem:[#allocation11 + $0x18] sm:$0xff] %v757_v42 }
 0x217   :  { %1003 = shalt.err (!%p1000_p10)
}
 0x218   :  { %773 = dma.vmem_to_hbm [thread:$0]  %s768_s15, 512, %s1236_s5, [#allocation5], %s1024_s28, %s1024_s28, %s1025_s29  }
 0x219   :  { %1018 = dma.done.wait [#allocation5], 512  }
 0x21a   :  { %1019 = vsyncadd [#allocation5], 4294966784 }
 0x21b   :  { %777 = vsyncpa [#allocation4], 1 }
 0x21c   :  { %778 = vsyncpa [#allocation7], 1 }
 0x21d   :  { %779 = vsyncpa [#allocation10], 1 }
 0x21e   :  { %780 = vsyncpa [#allocation5], 1 }

</bundles_post_ra>
